<compile_context>
chip_gen: v5e
topology: v5e:2x2
jax: 0.10.0
libtpu: 0.0.40
codegen_flags: <defaults>
</compile_context>

<pallas_src>
import functools
import math

import jax
import jax.numpy as jnp
from jax.experimental import pallas as pl
from jax.experimental.pallas import tpu as pltpu

LN_EPS = 1e-5  # PyTorch nn.LayerNorm default


def _round_up(v, m):
    return (v + m - 1) // m * m


def _vmem_capacity_bytes():
    try:
        info = pltpu.get_tpu_info()
        return int(getattr(info, "vmem_capacity_bytes", 64 * 1024 * 1024))
    except Exception:
        return 64 * 1024 * 1024


def _default_row_tile():
    # 512-row tiles on 128 MiB VMEM parts (v5e/v6e), 256 on v7x (64 MiB).
    return 512 if _vmem_capacity_bytes() >= 100 * 1024 * 1024 else 256


def _layernorm_masked(x, gamma, beta, real_dim):
    """LayerNorm over the last dim, ignoring zero-padded lanes >= real_dim.

    Assumes padded lanes of `x` are exactly zero (guaranteed by the wrapper's
    zero padding of inputs / weights / biases, and GELU(0) == 0).
    """
    d_pad = x.shape[-1]
    inv_d = jnp.float32(1.0 / real_dim)
    # Padded lanes are zero, so the plain sum equals the sum over real lanes.
    mean = jnp.sum(x, axis=-1, keepdims=True) * inv_d
    xc = x - mean
    if real_dim != d_pad:
        lane = jax.lax.broadcasted_iota(jnp.int32, x.shape, dimension=x.ndim - 1)
        xc = jnp.where(lane < real_dim, xc, 0.0)
    var = jnp.sum(xc * xc, axis=-1, keepdims=True) * inv_d  # biased, like PyTorch
    inv = jax.lax.rsqrt(var + jnp.float32(LN_EPS))
    # Padded lanes: xc==0 and gamma/beta padded with 0 -> output stays 0.
    return xc * inv * gamma + beta


def _gelu_exact(x):
    # nn.GELU() default (approximate='none'): 0.5 * x * (1 + erf(x / sqrt(2)))
    return 0.5 * x * (1.0 + jax.lax.erf(x * jnp.float32(0.7071067811865476)))


def mlp_kernel(x_ref, g1_ref, b1_ref, w1t_ref, bw1_ref,
               w2t_ref, bw2_ref, g2_ref, b2_ref, o_ref, acc_ref,
               *, in_dim, out_dim):
    j = pl.program_id(1)

    @pl.when(j == 0)
    def _():
        acc_ref[...] = jnp.zeros_like(acc_ref)

    # LayerNorm(in_dim) in f32.  Recomputed per hidden chunk; O(rt*in_p)
    # vector work vs O(rt*in_p*ck) MXU work -> negligible, and it keeps the
    # live f32 intermediate bounded to (rt, ck).
    xf = x_ref[...].astype(jnp.float32)
    h = _layernorm_masked(xf,
                          g1_ref[...].astype(jnp.float32),
                          b1_ref[...].astype(jnp.float32),
                          in_dim)

    # Linear(in_dim, in_dim) restricted to this hidden chunk:
    # (rt, in_p) x (in_p, ck) on the MXU, f32 accumulation.
    hc = jnp.dot(h.astype(w1t_ref.dtype), w1t_ref[...],
                 preferred_element_type=jnp.float32)
    hc = hc + bw1_ref[...].astype(jnp.float32)

    # GELU (exact, erf-based), f32.  GELU(0) == 0 keeps padded lanes zero.
    hc = _gelu_exact(hc)

    # Linear(in_dim, out_dim) chunk contribution: (rt, ck) x (ck, out_p),
    # accumulated across hidden chunks in f32 VMEM scratch.
    acc_ref[...] += jnp.dot(hc.astype(w2t_ref.dtype), w2t_ref[...],
                            preferred_element_type=jnp.float32)

    @pl.when(j == pl.num_programs(1) - 1)
    def _():
        h2 = acc_ref[...] + bw2_ref[...].astype(jnp.float32)
        h2 = _layernorm_masked(h2,
                               g2_ref[...].astype(jnp.float32),
                               b2_ref[...].astype(jnp.float32),
                               out_dim)
        o_ref[...] = h2.astype(o_ref.dtype)


def mlp_forward(x, params, row_tile=None, matmul_dtype=None):
    """x: (..., in_dim) -> (..., out_dim).

    row_tile:     rows per grid step (default: 512 on v5e/v6e, 256 on v7x).
    matmul_dtype: optional dtype for MXU operands (e.g. jnp.bfloat16 on
                  v6e/v7x); accumulation is always f32.
    """
    if row_tile is None:
        row_tile = _default_row_tile()
    return _mlp_forward(x, params, int(row_tile), matmul_dtype)


@functools.partial(jax.jit, static_argnums=(2, 3))
def _mlp_forward(x, params, row_tile, matmul_dtype):
    g1, b1, w1, bw1, w2, bw2, g2, b2 = params
    in_dim = w1.shape[1]
    out_dim = w2.shape[0]

    lead_shape = x.shape[:-1]
    n = math.prod(lead_shape) if lead_shape else 1
    x2 = x.reshape(n, in_dim)

    # ---- Padded feature dims (lane-dense) + hidden-dim chunking. ----------
    in_p = _round_up(in_dim, 128)
    out_p = _round_up(out_dim, 128)
    if in_p <= 1024:
        ck = in_p                       # single chunk: weights fully resident
    else:
        ck = 512                        # stream weights in 512-wide chunks
        in_p = _round_up(in_dim, ck)
    nk = in_p // ck

    # ---- Row tiling. -------------------------------------------------------
    sub = 8 if x.dtype.itemsize >= 4 else 16
    rt = min(_round_up(int(row_tile), sub), _round_up(n, sub))
    n_pad = _round_up(n, rt)

    # Zero-pad rows and feature dims; padded lanes stay exactly zero through
    # the whole kernel because padded weights/biases/gamma/beta are zero.
    x2 = jnp.pad(x2, ((0, n_pad - n), (0, in_p - in_dim)))

    # Pre-transpose weights once (outside the kernel) and pad.
    w1t = jnp.pad(w1.T, ((0, in_p - in_dim), (0, in_p - in_dim)))     # (in_p,  in_p)
    w2t = jnp.pad(w2.T, ((0, in_p - in_dim), (0, out_p - out_dim)))   # (in_p,  out_p)
    if matmul_dtype is not None:
        w1t = w1t.astype(matmul_dtype)
        w2t = w2t.astype(matmul_dtype)

    g1v = jnp.pad(g1, (0, in_p - in_dim)).reshape(1, in_p)
    b1v = jnp.pad(b1, (0, in_p - in_dim)).reshape(1, in_p)
    bw1v = jnp.pad(bw1, (0, in_p - in_dim)).reshape(1, in_p)
    bw2v = jnp.pad(bw2, (0, out_p - out_dim)).reshape(1, out_p)
    g2v = jnp.pad(g2, (0, out_p - out_dim)).reshape(1, out_p)
    b2v = jnp.pad(b2, (0, out_p - out_dim)).reshape(1, out_p)

    grid = (n_pad // rt, nk)

    # Grid-invariant blocks: single-buffered (they are DMA'd exactly once).
    def const_spec(shape):
        return pl.BlockSpec(shape, lambda i, j: (0, 0),
                            pipeline_mode=pl.Buffered(1))

    # Weight chunks: single-buffered when constant (nk == 1), double-buffered
    # when streamed across the hidden axis so the next chunk's DMA overlaps.
    w_mode = pl.Buffered(1) if nk == 1 else pl.Buffered(2)

    in_specs = [
        pl.BlockSpec((rt, in_p), lambda i, j: (i, 0)),                         # x row tile
        const_spec((1, in_p)),                                                 # ln1 gamma
        const_spec((1, in_p)),                                                 # ln1 beta
        pl.BlockSpec((in_p, ck), lambda i, j: (0, j), pipeline_mode=w_mode),   # W1^T chunk
        pl.BlockSpec((1, ck), lambda i, j: (0, j), pipeline_mode=w_mode),      # b1 chunk
        pl.BlockSpec((ck, out_p), lambda i, j: (j, 0), pipeline_mode=w_mode),  # W2^T chunk
        const_spec((1, out_p)),                                                # b2
        const_spec((1, out_p)),                                                # ln2 gamma
        const_spec((1, out_p)),                                                # ln2 beta
    ]
    out_spec = pl.BlockSpec((rt, out_p), lambda i, j: (i, 0))

    itemsize = jnp.dtype(x.dtype).itemsize
    w_itemsize = jnp.dtype(w1t.dtype).itemsize
    cost = pl.CostEstimate(
        flops=2 * n_pad * in_p * (in_p + out_p),
        transcendentals=n_pad * in_p,                      # erf in GELU
        bytes_accessed=(n_pad * (in_p + out_p) * itemsize
                        + (in_p * in_p + in_p * out_p) * w_itemsize),
    )

    kernel = functools.partial(mlp_kernel, in_dim=in_dim, out_dim=out_dim)

    out = pl.pallas_call(
        kernel,
        out_shape=jax.ShapeDtypeStruct((n_pad, out_p), x.dtype),
        grid=grid,
        in_specs=in_specs,
        out_specs=out_spec,
        scratch_shapes=[pltpu.VMEM((rt, out_p), jnp.float32)],
        compiler_params=pltpu.CompilerParams(
            dimension_semantics=("parallel", "arbitrary"),
            vmem_limit_bytes=int(_vmem_capacity_bytes() * 3 // 4),
        ),
        cost_estimate=cost,
    )(x2, g1v, b1v, w1t, bw1v, w2t, bw2v, g2v, b2v)

    out = out[:n, :out_dim]
    return out.reshape(*lead_shape, out_dim)


def init_params(key, in_dim, out_dim, dtype=jnp.float32):
    """Deterministic synthetic parameters matching the PyTorch module's shapes."""
    k1, k2, k3, k4 = jax.random.split(key, 4)
    # LayerNorm(in_dim): weight=1, bias=0 (PyTorch default init)
    g1 = jnp.ones((in_dim,), dtype)
    b1 = jnp.zeros((in_dim,), dtype)
    # Linear(in_dim, in_dim)
    lim1 = 1.0 / math.sqrt(in_dim)
    w1 = jax.random.uniform(k1, (in_dim, in_dim), dtype, -lim1, lim1)
    bw1 = jax.random.uniform(k2, (in_dim,), dtype, -lim1, lim1)
    # Linear(in_dim, out_dim)
    w2 = jax.random.uniform(k3, (out_dim, in_dim), dtype, -lim1, lim1)
    bw2 = jax.random.uniform(k4, (out_dim,), dtype, -lim1, lim1)
    # LayerNorm(out_dim)
    g2 = jnp.ones((out_dim,), dtype)
    b2 = jnp.zeros((out_dim,), dtype)
    return (g1, b1, w1, bw1, w2, bw2, g2, b2)


def mlp_reference(x, params):
    """Pure-JAX reference for correctness checking."""
    g1, b1, w1, bw1, w2, bw2, g2, b2 = params

    def ln(v, g, b):
        m = jnp.mean(v, axis=-1, keepdims=True)
        c = v - m
        var = jnp.mean(c * c, axis=-1, keepdims=True)
        return c * jax.lax.rsqrt(var + LN_EPS) * g + b

    h = ln(x, g1, b1)
    h = h @ w1.T + bw1
    h = 0.5 * h * (1.0 + jax.lax.erf(h / jnp.sqrt(2.0)))
    h = h @ w2.T + bw2
    return ln(h, g2, b2)


if __name__ == "__main__":
    B, S, IN_DIM, OUT_DIM = 2, 8, 32, 64

    key = jax.random.PRNGKey(0)
    kx, kp = jax.random.split(key)
    x = jax.random.normal(kx, (B, S, IN_DIM), jnp.float32)
    params = init_params(kp, IN_DIM, OUT_DIM)

    ref = mlp_reference(x, params)

    # Default path (f32 MXU operands): strict check against the f32 reference.
    out = jax.block_until_ready(mlp_forward(x, params))
    assert out.shape == (B, S, OUT_DIM)
    assert jnp.allclose(out, ref, atol=1e-4, rtol=1e-4), "mismatch vs reference (f32)"

    # bf16-MXU path (recommended on v6e/v7x): f32 accumulation, looser tolerance.
    out_bf16 = jax.block_until_ready(
        mlp_forward(x, params, matmul_dtype=jnp.bfloat16))
    assert out_bf16.shape == (B, S, OUT_DIM)
    assert jnp.allclose(out_bf16, ref, atol=5e-2, rtol=5e-2), "mismatch vs reference (bf16)"

    print("KERNEL_OK")
</pallas_src>

<mosaic_0001>
module attributes {stable_mosaic.version = 11 : i64} {
  func.func @mlp_kernel(%arg0: i32, %arg1: i32, %arg2: memref<16x128xf32, #tpu.memory_space<vmem>>, %arg3: memref<1x128xf32, #tpu.memory_space<vmem>>, %arg4: memref<1x128xf32, #tpu.memory_space<vmem>>, %arg5: memref<128x128xf32, #tpu.memory_space<vmem>>, %arg6: memref<1x128xf32, #tpu.memory_space<vmem>>, %arg7: memref<128x128xf32, #tpu.memory_space<vmem>>, %arg8: memref<1x128xf32, #tpu.memory_space<vmem>>, %arg9: memref<1x128xf32, #tpu.memory_space<vmem>>, %arg10: memref<1x128xf32, #tpu.memory_space<vmem>>, %arg11: memref<16x128xf32, #tpu.memory_space<vmem>>, %arg12: memref<16x128xf32, #tpu.memory_space<vmem>>) attributes {dimension_semantics = [#tpu.dimension_semantics<parallel>, #tpu.dimension_semantics<arbitrary>], iteration_bounds = array<i64: 1, 1>, scalar_prefetch = 0 : i64, scratch_operands = 1 : i64, tpu.core_type = #tpu.core_type<tc>, window_params = [{transform_indices = @transform_0, window_bounds = array<i64: 16, 128>}, {pipeline_mode = #tpu.pipeline_mode<synchronous>, transform_indices = @transform_1, window_bounds = array<i64: 1, 128>}, {pipeline_mode = #tpu.pipeline_mode<synchronous>, transform_indices = @transform_2, window_bounds = array<i64: 1, 128>}, {pipeline_mode = #tpu.pipeline_mode<synchronous>, transform_indices = @transform_3, window_bounds = array<i64: 128, 128>}, {pipeline_mode = #tpu.pipeline_mode<synchronous>, transform_indices = @transform_4, window_bounds = array<i64: 1, 128>}, {pipeline_mode = #tpu.pipeline_mode<synchronous>, transform_indices = @transform_5, window_bounds = array<i64: 128, 128>}, {pipeline_mode = #tpu.pipeline_mode<synchronous>, transform_indices = @transform_6, window_bounds = array<i64: 1, 128>}, {pipeline_mode = #tpu.pipeline_mode<synchronous>, transform_indices = @transform_7, window_bounds = array<i64: 1, 128>}, {pipeline_mode = #tpu.pipeline_mode<synchronous>, transform_indices = @transform_8, window_bounds = array<i64: 1, 128>}, {transform_indices = @transform_9, window_bounds = array<i64: 16, 128>}]} {
    %c0_i32 = arith.constant 0 : i32
    %0 = arith.cmpi eq, %arg1, %c0_i32 : i32
    %1 = arith.extui %0 : i1 to i32
    %c0_i32_0 = arith.constant 0 : i32
    %2 = arith.cmpi ne, %1, %c0_i32_0 : i32
    scf.if %2 {
      %cst_28 = arith.constant 0.000000e+00 : f32
      %52 = vector.broadcast %cst_28 : f32 to vector<16x128xf32>
      %c0_29 = arith.constant 0 : index
      %c0_30 = arith.constant 0 : index
      %53 = vector.load %arg12[%c0_29, %c0_30] : memref<16x128xf32, #tpu.memory_space<vmem>>, vector<16x128xf32>
      tpu.vector_store %arg12[%c0_29, %c0_30], %52 {strides = array<i32>} : memref<16x128xf32, #tpu.memory_space<vmem>>, vector<16x128xf32>,
    } else {
    }
    %c0 = arith.constant 0 : index
    %c0_1 = arith.constant 0 : index
    %3 = vector.load %arg2[%c0, %c0_1] : memref<16x128xf32, #tpu.memory_space<vmem>>, vector<16x128xf32>
    %c0_2 = arith.constant 0 : index
    %c0_3 = arith.constant 0 : index
    %4 = vector.load %arg3[%c0_2, %c0_3] : memref<1x128xf32, #tpu.memory_space<vmem>>, vector<1x128xf32>
    %c0_4 = arith.constant 0 : index
    %c0_5 = arith.constant 0 : index
    %5 = vector.load %arg4[%c0_4, %c0_5] : memref<1x128xf32, #tpu.memory_space<vmem>>, vector<1x128xf32>
    %cst = arith.constant dense<0.000000e+00> : vector<16xf32>
    %6 = vector.multi_reduction <add>, %3, %cst [1] : vector<16x128xf32> to vector<16xf32>
    %7 = vector.shape_cast %6 : vector<16xf32> to vector<16x1xf32>
    %cst_6 = arith.constant 3.125000e-02 : f32
    %8 = vector.broadcast %cst_6 : f32 to vector<16x1xf32>
    %9 = arith.mulf %7, %8 : vector<16x1xf32>
    %10 = vector.broadcast %9 : vector<16x1xf32> to vector<16x128xf32>
    %11 = arith.subf %3, %10 : vector<16x128xf32>
    %12 = tpu.iota {dimensions = array<i32: 1>} : vector<16x128xi32>
    %c32_i32 = arith.constant 32 : i32
    %13 = vector.broadcast %c32_i32 : i32 to vector<16x128xi32>
    %14 = arith.cmpi slt, %12, %13 : vector<16x128xi32>
    %cst_7 = arith.constant 0.000000e+00 : f32
    %15 = vector.broadcast %cst_7 : f32 to vector<16x128xf32>
    %16 = arith.select %14, %11, %15 : vector<16x128xi1>, vector<16x128xf32>
    %17 = arith.mulf %16, %16 : vector<16x128xf32>
    %cst_8 = arith.constant dense<0.000000e+00> : vector<16xf32>
    %18 = vector.multi_reduction <add>, %17, %cst_8 [1] : vector<16x128xf32> to vector<16xf32>
    %19 = vector.shape_cast %18 : vector<16xf32> to vector<16x1xf32>
    %cst_9 = arith.constant 3.125000e-02 : f32
    %20 = vector.broadcast %cst_9 : f32 to vector<16x1xf32>
    %21 = arith.mulf %19, %20 : vector<16x1xf32>
    %cst_10 = arith.constant 9.99999974E-6 : f32
    %22 = vector.broadcast %cst_10 : f32 to vector<16x1xf32>
    %23 = arith.addf %21, %22 : vector<16x1xf32>
    %24 = math.rsqrt %23 : vector<16x1xf32>
    %25 = vector.broadcast %24 : vector<16x1xf32> to vector<16x128xf32>
    %26 = arith.mulf %16, %25 : vector<16x128xf32>
    %27 = vector.broadcast %4 : vector<1x128xf32> to vector<16x128xf32>
    %28 = arith.mulf %26, %27 : vector<16x128xf32>
    %29 = vector.broadcast %5 : vector<1x128xf32> to vector<16x128xf32>
    %30 = arith.addf %28, %29 : vector<16x128xf32>
    %c0_11 = arith.constant 0 : index
    %c0_12 = arith.constant 0 : index
    %31 = vector.load %arg5[%c0_11, %c0_12] : memref<128x128xf32, #tpu.memory_space<vmem>>, vector<128x128xf32>
    %cst_13 = arith.constant dense<0.000000e+00> : vector<16x128xf32>
    %32 = tpu.matmul %30, %31, %cst_13 {dimension_numbers = #tpu.dot_dimension_numbers<[1], [0], [0], [1], [0, 0, 1, 1], [], []>} : vector<16x128xf32>, vector<128x128xf32>, vector<16x128xf32> -> vector<16x128xf32>
    %c0_14 = arith.constant 0 : index
    %c0_15 = arith.constant 0 : index
    %33 = vector.load %arg6[%c0_14, %c0_15] : memref<1x128xf32, #tpu.memory_space<vmem>>, vector<1x128xf32>
    %34 = vector.broadcast %33 : vector<1x128xf32> to vector<16x128xf32>
    %35 = arith.addf %32, %34 : vector<16x128xf32>
    %cst_16 = arith.constant 5.000000e-01 : f32
    %36 = vector.broadcast %cst_16 : f32 to vector<16x128xf32>
    %37 = arith.mulf %36, %35 : vector<16x128xf32>
    %cst_17 = arith.constant 0.707106769 : f32
    %38 = vector.broadcast %cst_17 : f32 to vector<16x128xf32>
    %39 = arith.mulf %35, %38 : vector<16x128xf32>
    %40 = math.erf %39 : vector<16x128xf32>
    %cst_18 = arith.constant 1.000000e+00 : f32
    %41 = vector.broadcast %cst_18 : f32 to vector<16x128xf32>
    %42 = arith.addf %41, %40 : vector<16x128xf32>
    %43 = arith.mulf %37, %42 : vector<16x128xf32>
    %c0_19 = arith.constant 0 : index
    %c0_20 = arith.constant 0 : index
    %44 = vector.load %arg12[%c0_19, %c0_20] : memref<16x128xf32, #tpu.memory_space<vmem>>, vector<16x128xf32>
    %c0_21 = arith.constant 0 : index
    %c0_22 = arith.constant 0 : index
    %45 = vector.load %arg7[%c0_21, %c0_22] : memref<128x128xf32, #tpu.memory_space<vmem>>, vector<128x128xf32>
    %cst_23 = arith.constant dense<0.000000e+00> : vector<16x128xf32>
    %46 = tpu.matmul %43, %45, %cst_23 {dimension_numbers = #tpu.dot_dimension_numbers<[1], [0], [0], [1], [0, 0, 1, 1], [], []>} : vector<16x128xf32>, vector<128x128xf32>, vector<16x128xf32> -> vector<16x128xf32>
    %47 = arith.addf %44, %46 : vector<16x128xf32>
    %c0_24 = arith.constant 0 : index
    %c0_25 = arith.constant 0 : index
    %48 = vector.load %arg12[%c0_24, %c0_25] : memref<16x128xf32, #tpu.memory_space<vmem>>, vector<16x128xf32>
    tpu.vector_store %arg12[%c0_24, %c0_25], %47 {strides = array<i32>} : memref<16x128xf32, #tpu.memory_space<vmem>>, vector<16x128xf32>,
    %c0_i32_26 = arith.constant 0 : i32
    %49 = arith.cmpi eq, %arg1, %c0_i32_26 : i32
    %50 = arith.extui %49 : i1 to i32
    %c0_i32_27 = arith.constant 0 : i32
    %51 = arith.cmpi ne, %50, %c0_i32_27 : i32
    scf.if %51 {
      %c0_28 = arith.constant 0 : index
      %c0_29 = arith.constant 0 : index
      %52 = vector.load %arg12[%c0_28, %c0_29] : memref<16x128xf32, #tpu.memory_space<vmem>>, vector<16x128xf32>
      %c0_30 = arith.constant 0 : index
      %c0_31 = arith.constant 0 : index
      %53 = vector.load %arg8[%c0_30, %c0_31] : memref<1x128xf32, #tpu.memory_space<vmem>>, vector<1x128xf32>
      %54 = vector.broadcast %53 : vector<1x128xf32> to vector<16x128xf32>
      %55 = arith.addf %52, %54 : vector<16x128xf32>
      %c0_32 = arith.constant 0 : index
      %c0_33 = arith.constant 0 : index
      %56 = vector.load %arg9[%c0_32, %c0_33] : memref<1x128xf32, #tpu.memory_space<vmem>>, vector<1x128xf32>
      %c0_34 = arith.constant 0 : index
      %c0_35 = arith.constant 0 : index
      %57 = vector.load %arg10[%c0_34, %c0_35] : memref<1x128xf32, #tpu.memory_space<vmem>>, vector<1x128xf32>
      %cst_36 = arith.constant dense<0.000000e+00> : vector<16xf32>
      %58 = vector.multi_reduction <add>, %55, %cst_36 [1] : vector<16x128xf32> to vector<16xf32>
      %59 = vector.shape_cast %58 : vector<16xf32> to vector<16x1xf32>
      %cst_37 = arith.constant 1.562500e-02 : f32
      %60 = vector.broadcast %cst_37 : f32 to vector<16x1xf32>
      %61 = arith.mulf %59, %60 : vector<16x1xf32>
      %62 = vector.broadcast %61 : vector<16x1xf32> to vector<16x128xf32>
      %63 = arith.subf %55, %62 : vector<16x128xf32>
      %64 = tpu.iota {dimensions = array<i32: 1>} : vector<16x128xi32>
      %c64_i32 = arith.constant 64 : i32
      %65 = vector.broadcast %c64_i32 : i32 to vector<16x128xi32>
      %66 = arith.cmpi slt, %64, %65 : vector<16x128xi32>
      %cst_38 = arith.constant 0.000000e+00 : f32
      %67 = vector.broadcast %cst_38 : f32 to vector<16x128xf32>
      %68 = arith.select %66, %63, %67 : vector<16x128xi1>, vector<16x128xf32>
      %69 = arith.mulf %68, %68 : vector<16x128xf32>
      %cst_39 = arith.constant dense<0.000000e+00> : vector<16xf32>
      %70 = vector.multi_reduction <add>, %69, %cst_39 [1] : vector<16x128xf32> to vector<16xf32>
      %71 = vector.shape_cast %70 : vector<16xf32> to vector<16x1xf32>
      %cst_40 = arith.constant 1.562500e-02 : f32
      %72 = vector.broadcast %cst_40 : f32 to vector<16x1xf32>
      %73 = arith.mulf %71, %72 : vector<16x1xf32>
      %cst_41 = arith.constant 9.99999974E-6 : f32
      %74 = vector.broadcast %cst_41 : f32 to vector<16x1xf32>
      %75 = arith.addf %73, %74 : vector<16x1xf32>
      %76 = math.rsqrt %75 : vector<16x1xf32>
      %77 = vector.broadcast %76 : vector<16x1xf32> to vector<16x128xf32>
      %78 = arith.mulf %68, %77 : vector<16x128xf32>
      %79 = vector.broadcast %56 : vector<1x128xf32> to vector<16x128xf32>
      %80 = arith.mulf %78, %79 : vector<16x128xf32>
      %81 = vector.broadcast %57 : vector<1x128xf32> to vector<16x128xf32>
      %82 = arith.addf %80, %81 : vector<16x128xf32>
      %c0_42 = arith.constant 0 : index
      %c0_43 = arith.constant 0 : index
      %83 = vector.load %arg11[%c0_42, %c0_43] : memref<16x128xf32, #tpu.memory_space<vmem>>, vector<16x128xf32>
      tpu.vector_store %arg11[%c0_42, %c0_43], %82 {strides = array<i32>} : memref<16x128xf32, #tpu.memory_space<vmem>>, vector<16x128xf32>,
    } else {
    }
    return
  }
  func.func @transform_0(%arg0: i32, %arg1: i32) -> (i32, i32) {
    %c0_i32 = arith.constant 0 : i32
    %c0_i32_0 = arith.constant 0 : i32
    return %arg0, %c0_i32 : i32, i32
  }
  func.func @transform_1(%arg0: i32, %arg1: i32) -> (i32, i32) {
    %c0_i32 = arith.constant 0 : i32
    %c0_i32_0 = arith.constant 0 : i32
    %c0_i32_1 = arith.constant 0 : i32
    return %c0_i32, %c0_i32_0 : i32, i32
  }
  func.func @transform_2(%arg0: i32, %arg1: i32) -> (i32, i32) {
    %c0_i32 = arith.constant 0 : i32
    %c0_i32_0 = arith.constant 0 : i32
    %c0_i32_1 = arith.constant 0 : i32
    return %c0_i32, %c0_i32_0 : i32, i32
  }
  func.func @transform_3(%arg0: i32, %arg1: i32) -> (i32, i32) {
    %c0_i32 = arith.constant 0 : i32
    %c0_i32_0 = arith.constant 0 : i32
    return %c0_i32, %arg1 : i32, i32
  }
  func.func @transform_4(%arg0: i32, %arg1: i32) -> (i32, i32) {
    %c0_i32 = arith.constant 0 : i32
    %c0_i32_0 = arith.constant 0 : i32
    return %c0_i32, %arg1 : i32, i32
  }
  func.func @transform_5(%arg0: i32, %arg1: i32) -> (i32, i32) {
    %c0_i32 = arith.constant 0 : i32
    %c0_i32_0 = arith.constant 0 : i32
    return %arg1, %c0_i32 : i32, i32
  }
  func.func @transform_6(%arg0: i32, %arg1: i32) -> (i32, i32) {
    %c0_i32 = arith.constant 0 : i32
    %c0_i32_0 = arith.constant 0 : i32
    %c0_i32_1 = arith.constant 0 : i32
    return %c0_i32, %c0_i32_0 : i32, i32
  }
  func.func @transform_7(%arg0: i32, %arg1: i32) -> (i32, i32) {
    %c0_i32 = arith.constant 0 : i32
    %c0_i32_0 = arith.constant 0 : i32
    %c0_i32_1 = arith.constant 0 : i32
    return %c0_i32, %c0_i32_0 : i32, i32
  }
  func.func @transform_8(%arg0: i32, %arg1: i32) -> (i32, i32) {
    %c0_i32 = arith.constant 0 : i32
    %c0_i32_0 = arith.constant 0 : i32
    %c0_i32_1 = arith.constant 0 : i32
    return %c0_i32, %c0_i32_0 : i32, i32
  }
  func.func @transform_9(%arg0: i32, %arg1: i32) -> (i32, i32) {
    %c0_i32 = arith.constant 0 : i32
    %c0_i32_0 = arith.constant 0 : i32
    return %arg0, %c0_i32 : i32, i32
  }
}

</mosaic_0001>

<bundles_post_ra>
// kernel: _mlp_forward.1
= control target key start
LH: loop header
LB: loop body
LE: loop exit
PB: predicated region body
PF: predicated region fallthrough
CT: control target
= control target key end

     0   :  { %v50_v4 = vlaneseq  ;;  %s617_s0 = inlined_call_operand.vmem [shape: f32[16,128], index: 0, kind: input, shape index: {}]   ;;  %s618_s3 = inlined_call_operand.vmem [shape: f32[128,128], index: 3, kind: input, shape index: {}]   ;;  %s619_s1 = inlined_call_operand.vmem [shape: f32[1,128], index: 1, kind: input, shape index: {}]   ;;  %s620_s2 = inlined_call_operand.vmem [shape: f32[1,128], index: 2, kind: input, shape index: {}]   ;;  %s621_s4 = inlined_call_operand.vmem [shape: f32[1,128], index: 4, kind: input, shape index: {}]   ;;  %s622_s6 = inlined_call_operand.vmem [shape: f32[1,128], index: 6, kind: input, shape index: {}]   ;;  %s623_s5 = inlined_call_operand.vmem [shape: f32[128,128], index: 5, kind: input, shape index: {}]   ;;  %s624_s7 = inlined_call_operand.vmem [shape: f32[1,128], index: 7, kind: input, shape index: {}]   ;;  %s625_s8 = inlined_call_operand.vmem [shape: f32[1,128], index: 8, kind: input, shape index: {}]   ;;  %s626_s9 = inlined_call_operand.vmem [shape: f32[16,128], index: 9, kind: output, shape index: {}]  }
   0x1   :  { %v39_v0 = vld [vmem:[%s617_s0 + $0x8] sm:$0xff]  ;;  %v38_v1 = vld [vmem:[%s617_s0] sm:$0xff]  ;;  %v112_v2 = vld [vmem:[%s618_s3 + $0x78] sm:$0xff] }
   0x2   :  { %44 = vadd.xlane.f32.xlu0 %v39_v0  ;;  %v111_v3 = vld [vmem:[%s618_s3 + $0x70] sm:$0xff]  ;;  %347 = vmatpush.msra.mxu2 %v112_v2  ;;  %v459_v5 = vand.u32 127, %v50_v4  ;;  %v110_v16 = vld [vmem:[%s618_s3 + $0x68] sm:$0xff]  ;;  %v109_v17 = vld [vmem:[%s618_s3 + $0x60] sm:$0xff] }
   0x3   :  { %117 = vmatpush.msra.mxu0 %v112_v2  ;;  %v108_v18 = vld [vmem:[%s618_s3 + $0x58] sm:$0xff]  ;;  %v107_v19 = vld [vmem:[%s618_s3 + $0x50] sm:$0xff]  ;;  %v106_v20 = vld [vmem:[%s618_s3 + $0x48] sm:$0xff] }
   0x4   :  { %348 = vmatpush.msra.mxu2 %v111_v3  ;;  %vm52_vm0 = vcmp.lt.s32.totalorder %v459_v5, 32  ;;  %v105_v21 = vld [vmem:[%s618_s3 + $0x40] sm:$0xff]  ;;  %v104_v22 = vld [vmem:[%s618_s3 + $0x38] sm:$0xff]  ;;  %v103_v23 = vld [vmem:[%s618_s3 + $0x30] sm:$0xff]  ;;  %vm294_vm15 = vcmp.lt.s32.totalorder %v459_v5, 64 }
   0x5   :  { %118 = vmatpush.msra.mxu0 %v111_v3  ;;  %v102_v24 = vld [vmem:[%s618_s3 + $0x28] sm:$0xff]  ;;  %v101_v25 = vld [vmem:[%s618_s3 + $0x20] sm:$0xff]  ;;  %v100_v26 = vld [vmem:[%s618_s3 + $0x18] sm:$0xff] }
   0x6   :  { %349 = vmatpush.msra.mxu2 %v110_v16  ;;  %v99_v27 = vld [vmem:[%s618_s3 + $0x10] sm:$0xff]  ;;  %v98_v28 = vld [vmem:[%s618_s3 + $0x8] sm:$0xff]  ;;  %v97_v29 = vld [vmem:[%s618_s3] sm:$0xff] }
   0x7   :  { %119 = vmatpush.msra.mxu0 %v110_v16  ;;  %v379_v44 = vld [vmem:[%s619_s1] ss:$0 sm:$0xff]  ;;  %v245_v58 = vld [vmem:[%s623_s5 + $0x78] sm:$0xff]  ;;  %v244_v59 = vld [vmem:[%s623_s5 + $0x70] sm:$0xff] }
   0x8   :  { %350 = vmatpush.msra.mxu2 %v109_v17  ;;  %v380_v48 = vld [vmem:[%s620_s2] ss:$0 sm:$0xff]  ;;  %363 = vmatpush.msra.mxu3 %v245_v58  ;;  %v243_v60 = vld [vmem:[%s623_s5 + $0x68] sm:$0xff]  ;;  %v241_v63 = vld [vmem:[%s623_s5 + $0x58] sm:$0xff] }
   0x9   :  { %120 = vmatpush.msra.mxu0 %v109_v17  ;;  %246 = vmatpush.msra.mxu1 %v245_v58  ;;  %v242_v61 = vld [vmem:[%s623_s5 + $0x60] sm:$0xff]  ;;  %v239_v2 = vld [vmem:[%s623_s5 + $0x48] sm:$0xff] }
   0xa   :  { %42 = vadd.xlane.f32.xlu0 %v38_v1  ;;  %351 = vmatpush.msra.mxu2 %v108_v18  ;;  %v381_v62 = vld [vmem:[%s621_s4] ss:$0 sm:$0xff] }
   0xb   :  { %121 = vmatpush.msra.mxu0 %v108_v18  ;;  %364 = vmatpush.msra.mxu3 %v244_v59 }
   0xc   :  { %352 = vmatpush.msra.mxu2 %v107_v19  ;;  %247 = vmatpush.msra.mxu1 %v244_v59 }
   0xd   :  { %122 = vmatpush.msra.mxu0 %v107_v19  ;;  %365 = vmatpush.msra.mxu3 %v243_v60  ;;  %v234_v19 = vld [vmem:[%s623_s5 + $0x20] sm:$0xff] }
   0xe   :  { %353 = vmatpush.msra.mxu2 %v106_v20  ;;  %248 = vmatpush.msra.mxu1 %v243_v60 }
   0xf   :  { %123 = vmatpush.msra.mxu0 %v106_v20  ;;  %366 = vmatpush.msra.mxu3 %v242_v61 }
  0x10   :  { %354 = vmatpush.msra.mxu2 %v105_v21  ;;  %249 = vmatpush.msra.mxu1 %v242_v61 }
  0x11   :  { %124 = vmatpush.msra.mxu0 %v105_v21  ;;  %367 = vmatpush.msra.mxu3 %v241_v63 }
  0x12   :  { %355 = vmatpush.msra.mxu2 %v104_v22  ;;  %250 = vmatpush.msra.mxu1 %v241_v63 }
  0x13   :  { %125 = vmatpush.msra.mxu0 %v104_v22 }
  0x14   :  { %356 = vmatpush.msra.mxu2 %v103_v23 }
  0x15   :  { %126 = vmatpush.msra.mxu0 %v103_v23  ;;  %v233_v23 = vld [vmem:[%s623_s5 + $0x18] sm:$0xff] }
  0x16   :  { %357 = vmatpush.msra.mxu2 %v102_v24 }
  0x17   :  { %127 = vmatpush.msra.mxu0 %v102_v24 }
  0x18   :  { %358 = vmatpush.msra.mxu2 %v101_v25 }
  0x19   :  { %128 = vmatpush.msra.mxu0 %v101_v25 }
  0x1a   :  { %359 = vmatpush.msra.mxu2 %v100_v26 }
  0x1b   :  { %129 = vmatpush.msra.mxu0 %v100_v26 }
  0x1c   :  { %360 = vmatpush.msra.mxu2 %v99_v27 }
  0x1d   :  { %130 = vmatpush.msra.mxu0 %v99_v27 }
  0x1e   :  { %361 = vmatpush.msra.mxu2 %v98_v28 }
  0x1f   :  { %131 = vmatpush.msra.mxu0 %v98_v28  ;;  %v232_v28 = vld [vmem:[%s623_s5 + $0x10] sm:$0xff] }
  0x20   :  { %362 = vmatpush.msra.mxu2 %v97_v29 }
  0x21   :  { %132 = vmatpush.msra.mxu0 %v97_v29 }
  0x75   :  { %v45_v6 = vpop.xlane.xlu0 %44 }
  0x76   :  { %v47_v7 = vmul.f32 0.03125, %v45_v6  ;;  %v238_v6 = vld [vmem:[%s623_s5 + $0x40] sm:$0xff] }
  0x78   :  { %v49_v8 = vsub.f32 %v39_v0, %v47_v7  ;;  %v240_v0 = vld [vmem:[%s623_s5 + $0x50] sm:$0xff] }
  0x79   :  { %368 = vmatpush.msra.mxu3 %v240_v0  ;;  %251 = vmatpush.msra.mxu1 %v240_v0 }
  0x7a   :  { %v462_v9 = vsel %vm52_vm0, %v49_v8, 0.0 }
  0x7b   :  { %v56_v10 = vmul.f32 %v462_v9, %v462_v9  ;;  %369 = vmatpush.msra.mxu3 %v239_v2  ;;  %252 = vmatpush.msra.mxu1 %v239_v2 }
  0x7d   :  { %59 = vadd.xlane.f32.xlu1 %v56_v10  ;;  %v43_v11 = vpop.xlane.xlu0 %42  ;;  %370 = vmatpush.msra.mxu3 %v238_v6 }
  0x7e   :  { %v46_v12 = vmul.f32 0.03125, %v43_v11  ;;  %253 = vmatpush.msra.mxu1 %v238_v6 }
  0x80   :  { %v48_v13 = vsub.f32 %v38_v1, %v46_v12  ;;  %v236_v12 = vld [vmem:[%s623_s5 + $0x30] sm:$0xff] }
  0x82   :  { %v466_v14 = vsel %vm52_vm0, %v48_v13, 0.0 }
  0x83   :  { %v55_v15 = vmul.f32 %v466_v14, %v466_v14 }
  0x85   :  { %57 = vadd.xlane.f32.xlu1 %v55_v15  ;;  %v235_v15 = vld [vmem:[%s623_s5 + $0x28] sm:$0xff] }
  0xf0   :  { %v60_v30 = vpop.xlane.xlu1 %59 }
  0xf1   :  { %v62_v31 = vmul.f32 0.03125, %v60_v30 }
  0xf3   :  { %v64_v32 = vadd.f32 1e-05, %v62_v31 }
  0xf5   :  { %385 = vrsqrt.f32 %v64_v32  ;;  %vm81_vm2 = vweird.f32 %v64_v32 }
  0xf8   :  { %v58_v33 = vpop.xlane.xlu1 %57 }
  0xf9   :  { %v61_v34 = vmul.f32 0.03125, %v58_v33  ;;  %v231_v33 = vld [vmem:[%s623_s5 + $0x8] sm:$0xff] }
  0xfb   :  { %v386_v35 = vpop.eup %385  ;;  %v63_v36 = vadd.f32 1e-05, %v61_v34 }
  0xfc   :  { %v76_v37 = vmul.f32 %v386_v35, %v64_v32  ;;  %vm82_vm1 = vweird.f32 %v386_v35 }
  0xfd   :  { %387 = vrsqrt.f32 %v63_v36  ;;  %vm83_vm3 = vmor %vm81_vm2, %vm82_vm1  ;;  %vm71_vm5 = vweird.f32 %v63_v36 }
  0xfe   :  { %v77_v38 = vmul.f32 %v386_v35, %v76_v37  ;;  %v230_v37 = vld [vmem:[%s623_s5] sm:$0xff] }
 0x100   :  { %v78_v39 = vmul.f32 0.5, %v77_v38 }
 0x102   :  { %v79_v40 = vsub.f32 1.5, %v78_v39 }
 0x103   :  { %v388_v41 = vpop.eup %387 }
 0x104   :  { %v80_v42 = vmul.f32 %v386_v35, %v79_v40  ;;  %v66_v43 = vmul.f32 %v388_v41, %v63_v36  ;;  %vm72_vm4 = vweird.f32 %v388_v41 }
 0x105   :  { %vm73_vm6 = vmor %vm71_vm5, %vm72_vm4 }
 0x106   :  { %v67_v45 = vmul.f32 %v388_v41, %v66_v43  ;;  %v84_v46 = vsel %vm83_vm3, %v386_v35, %v80_v42 }
 0x107   :  { %v86_v47 = vmul.f32 %v84_v46, %v462_v9  ;;  %v237_v9 = vld [vmem:[%s623_s5 + $0x38] sm:$0xff] }
 0x108   :  { %v68_v49 = vmul.f32 0.5, %v67_v45  ;;  %371 = vmatpush.msra.mxu3 %v237_v9  ;;  %254 = vmatpush.msra.mxu1 %v237_v9 }
 0x109   :  { %v91_v50 = vmul.f32 %v379_v44, %v86_v47 }
 0x10a   :  { %v69_v51 = vsub.f32 1.5, %v68_v49  ;;  %372 = vmatpush.msra.mxu3 %v236_v12  ;;  %255 = vmatpush.msra.mxu1 %v236_v12 }
 0x10b   :  { %v96_v52 = vadd.f32 %v380_v48, %v91_v50 }
 0x10c   :  { %v70_v53 = vmul.f32 %v388_v41, %v69_v51  ;;  %373 = vmatpush.msra.mxu3 %v235_v15  ;;  %256 = vmatpush.msra.mxu1 %v235_v15 }
 0x10d   :  { %136 = vmatmul.f32.vlgmr.msra.gmra.mxu2 %v96_v52 }
 0x10e   :  { %v74_v54 = vsel %vm73_vm6, %v388_v41, %v70_v53  ;;  %374 = vmatpush.msra.mxu3 %v234_v19  ;;  %257 = vmatpush.msra.mxu1 %v234_v19 }
 0x10f   :  { %v85_v55 = vmul.f32 %v74_v54, %v466_v14 }
 0x110   :  { %375 = vmatpush.msra.mxu3 %v233_v23  ;;  %258 = vmatpush.msra.mxu1 %v233_v23 }
 0x111   :  { %v90_v56 = vmul.f32 %v379_v44, %v85_v55 }
 0x112   :  { %376 = vmatpush.msra.mxu3 %v232_v28  ;;  %259 = vmatpush.msra.mxu1 %v232_v28 }
 0x113   :  { %v95_v57 = vadd.f32 %v380_v48, %v90_v56 }
 0x114   :  { %377 = vmatpush.msra.mxu3 %v231_v33  ;;  %260 = vmatpush.msra.mxu1 %v231_v33 }
 0x115   :  { %133 = vmatmul.f32.vlgmr.msra.gmra.mxu0 %v95_v57 }
 0x116   :  { %378 = vmatpush.msra.mxu3 %v230_v37  ;;  %261 = vmatpush.msra.mxu1 %v230_v37 }
 0x190   :  { %v137_v1 = vpop.f32.mrf.mxu2 }
 0x191   :  { %v544_v3 = vadd.f32 %v381_v62, %v137_v1 }
 0x192   :  { %v134_v4 = vpop.f32.mrf.mxu0 }
 0x193   :  { %v550_v7 = vmul.f32 0.70710677, %v544_v3  ;;  %v552_v8 = vadd.f32 %v381_v62, %v134_v4  ;;  %v141_v28 = vmul.f32 0.5, %v544_v3 }
 0x195   :  { %v184_v10 = vmul.f32 %v550_v7, %v550_v7  ;;  %v560_v11 = vmul.f32 0.70710677, %v552_v8 }
 0x197   :  { %v565_v13 = vmin.f32 %v184_v10, 16.0  ;;  %v144_v14 = vmul.f32 %v560_v11, %v560_v11 }
 0x199   :  { %v186_v16 = vmul.f32 2.1237322e-06, %v565_v13  ;;  %v145_v17 = vmin.f32 %v144_v14, 16.0  ;;  %v197_v18 = vmul.f32 3.8918573e-05, %v565_v13 }
 0x19b   :  { %v187_v20 = vadd.f32 0.00028619796, %v186_v16  ;;  %v146_v21 = vmul.f32 2.1237322e-06, %v145_v17  ;;  %v198_v22 = vadd.f32 0.001143296, %v197_v18 }
 0x19c   :  { %v157_v24 = vmul.f32 3.8918573e-05, %v145_v17 }
 0x19d   :  { %v188_v25 = vmul.f32 %v187_v20, %v565_v13  ;;  %v147_v26 = vadd.f32 0.00028619796, %v146_v21  ;;  %v199_v27 = vmul.f32 %v198_v22, %v565_v13 }
 0x19e   :  { %v158_v29 = vadd.f32 0.001143296, %v157_v24 }
 0x19f   :  { %v148_v30 = vmul.f32 %v147_v26, %v145_v17  ;;  %v200_v31 = vadd.f32 0.014752088, %v199_v27  ;;  %v189_v32 = vadd.f32 0.0036580483, %v188_v25 }
 0x1a0   :  { %v159_v34 = vmul.f32 %v158_v29, %v145_v17 }
 0x1a1   :  { %v201_v35 = vmul.f32 %v200_v31, %v565_v13  ;;  %v149_v36 = vadd.f32 0.0036580483, %v148_v30  ;;  %v190_v40 = vmul.f32 %v189_v32, %v565_v13  ;;  %v140_v31 = vmul.f32 0.5, %v552_v8 }
 0x1a2   :  { %v160_v38 = vadd.f32 0.014752088, %v159_v34 }
 0x1a3   :  { %v202_v39 = vadd.f32 0.112945676, %v201_v35  ;;  %v150_v43 = vmul.f32 %v149_v36, %v145_v17  ;;  %v191_v46 = vadd.f32 0.05243302, %v190_v40 }
 0x1a4   :  { %v161_v41 = vmul.f32 %v160_v38, %v145_v17 }
 0x1a5   :  { %v203_v42 = vmul.f32 %v202_v39, %v565_v13  ;;  %v151_v49 = vadd.f32 0.05243302, %v150_v43  ;;  %v192_v52 = vmul.f32 %v191_v46, %v565_v13 }
 0x1a6   :  { %v162_v44 = vadd.f32 0.112945676, %v161_v41 }
 0x1a7   :  { %v204_v45 = vadd.f32 0.4994258, %v203_v42  ;;  %v152_v54 = vmul.f32 %v151_v49, %v145_v17  ;;  %v193_v56 = vadd.f32 0.18741608, %v192_v52 }
 0x1a8   :  { %v163_v47 = vmul.f32 %v162_v44, %v145_v17 }
 0x1a9   :  { %v205_v48 = vmul.f32 %v204_v45, %v565_v13  ;;  %v153_v57 = vadd.f32 0.18741608, %v152_v54  ;;  %v194_v59 = vmul.f32 %v193_v56, %v565_v13 }
 0x1aa   :  { %v164_v50 = vadd.f32 0.4994258, %v163_v47 }
 0x1ab   :  { %v206_v51 = vadd.f32 1.0, %v205_v48  ;;  %v154_v62 = vmul.f32 %v153_v57, %v145_v17  ;;  %v195_v2 = vadd.f32 1.1283791, %v194_v59  ;;  %v383_v59 = vld [vmem:[%s624_s7] ss:$0 sm:$0xff] }
 0x1ac   :  { %v165_v53 = vmul.f32 %v164_v50, %v145_v17 }
 0x1ad   :  { %389 = vrcp.f32 %v206_v51  ;;  %v218_v0 = vand.u32 2147483648, %v206_v51  ;;  %v216_v6 = vand.u32 2147483647, %v206_v51  ;;  %v155_v10 = vadd.f32 1.1283791, %v154_v62 }
 0x1ae   :  { %v166_v55 = vadd.f32 1.0, %v165_v53  ;;  %vm212_vm8 = vweird.f32 %v206_v51  ;;  %v196_v18 = vmul.f32 %v195_v2, %v550_v7  ;;  %v384_v62 = vld [vmem:[%s625_s8] ss:$0 sm:$0xff] }
 0x1af   :  { %v219_v15 = vor.u32 1.1754944e-38, %v218_v0  ;;  %vm217_vm11 = vcmp.eq.f32.partialorder %v216_v6, 8.507059e+37  ;;  %v156_v23 = vmul.f32 %v155_v10, %v560_v11  ;;  %v382_v11 = vld [vmem:[%s622_s6] ss:$0 sm:$0xff] }
 0x1b0   :  { %391 = vrcp.f32 %v166_v55  ;;  %v178_v14 = vand.u32 2147483648, %v166_v55  ;;  %v176_v13 = vand.u32 2147483647, %v166_v55  ;;  %vm172_vm12 = vweird.f32 %v166_v55 }
 0x1b2   :  { %v179_v22 = vor.u32 1.1754944e-38, %v178_v14  ;;  %vm177_vm14 = vcmp.eq.f32.partialorder %v176_v13, 8.507059e+37 }
 0x1b3   :  { %v390_v58 = vpop.eup %389 }
 0x1b4   :  { %v208_v60 = vmul.f32 %v390_v58, %v206_v51  ;;  %vm213_vm7 = vweird.f32 %v390_v58 }
 0x1b5   :  { %vm214_vm9 = vmor %vm212_vm8, %vm213_vm7 }
 0x1b6   :  { %v392_v61 = vpop.eup %391  ;;  %v209_v63 = vsub.f32 1.0, %v208_v60 }
 0x1b7   :  { %v168_v1 = vmul.f32 %v392_v61, %v166_v55  ;;  %vm173_vm10 = vweird.f32 %v392_v61 }
 0x1b8   :  { %v210_v4 = vmul.f32 %v390_v58, %v209_v63  ;;  %vm174_vm13 = vmor %vm172_vm12, %vm173_vm10 }
 0x1b9   :  { %v169_v9 = vsub.f32 1.0, %v168_v1 }
 0x1ba   :  { %v211_v12 = vadd.f32 %v390_v58, %v210_v4 }
 0x1bb   :  { %v170_v16 = vmul.f32 %v392_v61, %v169_v9 }
 0x1bc   :  { %v215_v17 = vsel %vm214_vm9, %v390_v58, %v211_v12 }
 0x1bd   :  { %v220_v19 = vsel %vm217_vm11, %v219_v15, %v215_v17  ;;  %v171_v20 = vadd.f32 %v392_v61, %v170_v16 }
 0x1be   :  { %v221_v21 = vmul.f32 %v220_v19, %v196_v18 }
 0x1bf   :  { %v175_v24 = vsel %vm174_vm13, %v392_v61, %v171_v20 }
 0x1c0   :  { %v346_v25 = vclamps-f32 %v221_v21, 1.0  ;;  %v180_v26 = vsel %vm177_vm14, %v179_v22, %v175_v24 }
 0x1c1   :  { %v181_v27 = vmul.f32 %v180_v26, %v156_v23 }
 0x1c2   :  { %v225_v29 = vadd.f32 1.0, %v346_v25 }
 0x1c3   :  { %v345_v30 = vclamps-f32 %v181_v27, 1.0 }
 0x1c4   :  { %v227_v7 = vmul.f32 %v225_v29, %v141_v28 }
 0x1c5   :  { %v224_v32 = vadd.f32 1.0, %v345_v30 }
 0x1c6   :  { %265 = vmatmul.f32.vlgmr.msra.gmra.mxu3 %v227_v7 }
 0x1c7   :  { %v226_v33 = vmul.f32 %v224_v32, %v140_v31 }
 0x1c9   :  { %262 = vmatmul.f32.vlgmr.msra.gmra.mxu1 %v226_v33 }
 0x246   :  { %v263_v34 = vpop.f32.mrf.mxu1 }
 0x247   :  { %v282_v35 = vadd.f32 %v382_v11, %v263_v34 }
 0x249   :  { %286 = vadd.xlane.f32.xlu2 %v282_v35  ;;  %v266_v36 = vpop.f32.mrf.mxu3 }
 0x24a   :  { %v283_v37 = vadd.f32 %v382_v11, %v266_v36 }
 0x251   :  { %288 = vadd.xlane.f32.xlu2 %v283_v37 }
 0x2bc   :  { %v287_v3 = vpop.xlane.xlu2 %286 }
 0x2bd   :  { %v290_v38 = vmul.f32 0.015625, %v287_v3 }
 0x2bf   :  { %v292_v39 = vsub.f32 %v282_v35, %v290_v38 }
 0x2c1   :  { %v295_v8 = vsel %vm294_vm15, %v292_v39, 0.0 }
 0x2c2   :  { %v297_v40 = vmul.f32 %v295_v8, %v295_v8 }
 0x2c4   :  { %299 = vadd.xlane.f32.xlu0 %v297_v40  ;;  %v289_v41 = vpop.xlane.xlu2 %288 }
 0x2c5   :  { %v291_v42 = vmul.f32 0.015625, %v289_v41 }
 0x2c7   :  { %v293_v43 = vsub.f32 %v283_v37, %v291_v42 }
 0x2c9   :  { %v296_v44 = vsel %vm294_vm15, %v293_v43, 0.0 }
 0x2ca   :  { %v298_v45 = vmul.f32 %v296_v44, %v296_v44 }
 0x2cc   :  { %301 = vadd.xlane.f32.xlu1 %v298_v45 }
 0x337   :  { %v300_v46 = vpop.xlane.xlu0 %299 }
 0x338   :  { %v303_v47 = vmul.f32 0.015625, %v300_v46 }
 0x33a   :  { %v305_v48 = vadd.f32 1e-05, %v303_v47 }
 0x33c   :  { %393 = vrsqrt.f32 %v305_v48  ;;  %vm313_vm1 = vweird.f32 %v305_v48 }
 0x33f   :  { %v302_v49 = vpop.xlane.xlu1 %301 }
 0x340   :  { %v304_v50 = vmul.f32 0.015625, %v302_v49 }
 0x342   :  { %v394_v51 = vpop.eup %393  ;;  %v306_v52 = vadd.f32 1e-05, %v304_v50 }
 0x343   :  { %v308_v53 = vmul.f32 %v394_v51, %v305_v48  ;;  %vm314_vm0 = vweird.f32 %v394_v51 }
 0x344   :  { %395 = vrsqrt.f32 %v306_v52  ;;  %vm315_vm2 = vmor %vm313_vm1, %vm314_vm0  ;;  %vm323_vm4 = vweird.f32 %v306_v52 }
 0x345   :  { %v309_v5 = vmul.f32 %v394_v51, %v308_v53 }
 0x347   :  { %v310_v54 = vmul.f32 0.5, %v309_v5 }
 0x349   :  { %v311_v55 = vsub.f32 1.5, %v310_v54 }
 0x34a   :  { %v396_v56 = vpop.eup %395 }
 0x34b   :  { %v312_v57 = vmul.f32 %v394_v51, %v311_v55  ;;  %v318_v58 = vmul.f32 %v396_v56, %v306_v52  ;;  %vm324_vm3 = vweird.f32 %v396_v56 }
 0x34c   :  { %vm325_vm5 = vmor %vm323_vm4, %vm324_vm3 }
 0x34d   :  { %v316_v60 = vsel %vm315_vm2, %v394_v51, %v312_v57  ;;  %v319_v61 = vmul.f32 %v396_v56, %v318_v58 }
 0x34e   :  { %v327_v63 = vmul.f32 %v316_v60, %v295_v8 }
 0x34f   :  { %v320_v0 = vmul.f32 0.5, %v319_v61 }
 0x350   :  { %v332_v1 = vmul.f32 %v383_v59, %v327_v63 }
 0x351   :  { %v321_v2 = vsub.f32 1.5, %v320_v0 }
 0x352   :  { %v337_v4 = vadd.f32 %v384_v62, %v332_v1 }
 0x353   :  { %v322_v6 = vmul.f32 %v396_v56, %v321_v2 }
 0x354   :  { %339 = vst [vmem:[%s626_s9] sm:$0xff] %v337_v4 }
 0x355   :  { %v326_v9 = vsel %vm325_vm5, %v396_v56, %v322_v6 }
 0x356   :  { %v328_v10 = vmul.f32 %v326_v9, %v296_v44 }
 0x358   :  { %v333_v12 = vmul.f32 %v383_v59, %v328_v10 }
 0x35a   :  { %v338_v14 = vadd.f32 %v384_v62, %v333_v12 }
 0x35c   :  { %340 = vst [vmem:[%s626_s9 + $0x8] sm:$0xff] %v338_v14 }

</bundles_post_ra>
